<compile_context>
chip_gen: v7x
topology: tpu7x:2x2x1
jax: 0.10.0
libtpu: 0.0.40
codegen_flags: <defaults>
</compile_context>

<pallas_src>
import functools

import jax
import jax.numpy as jnp
from jax.experimental import pallas as pl
from jax.experimental.pallas import tpu as pltpu

_SUBLANES = 8


def _round_up(x, m):
    return (x + m - 1) // m * m


def _vmem_limit_bytes(streaming_bytes, resident_bytes):
    # streamed blocks are double-buffered by the pipeline; residents are not streamed.
    need = 2 * int(streaming_bytes) + int(resident_bytes) + (4 << 20)
    cap = 48 << 20            # v7x: 64 MiB physical per TC -> leave headroom; v5e: don't over-request
    try:
        kind = jax.devices()[0].device_kind.lower()
        if "v6" in kind:      # v6e: 128 MiB physical VMEM, allow larger per-step blocks
            cap = 96 << 20
    except Exception:
        pass
    return int(min(max(need, 16 << 20), cap))


def _layer_norm(x, gamma, beta, eps):
    # PyTorch LayerNorm: biased variance, eps inside the sqrt; all math in f32.
    mean = jnp.mean(x, axis=-1, keepdims=True)
    centered = x - mean
    var = jnp.mean(centered * centered, axis=-1, keepdims=True)
    return centered * jax.lax.rsqrt(var + eps) * gamma + beta


# ---------------------------------------------------------------------------
# Fused kernel: per batch element, gather+sum text embeddings, image Linears,
# LayerNorm, write directly into the concatenated output block.
# ---------------------------------------------------------------------------
def _fused_embedding_kernel(
        txt_ids_smem,                       # SMEM (B, S_txt) int32  (scalar prefetch)
        pt_ids_ref, tt_ids_ref,             # VMEM (S_txt, 1) int32
        x_img_ref, x_loc_ref,               # VMEM (S_img, F), (S_img, LOC_PAD)
        word_hbm,                           # ANY  (vocab, D)  -- manual DMA gather
        pos_tab_ref,                        # VMEM (S_txt, D)   resident
        pt_tab_ref, tt_tab_ref,             # VMEM (P_pad, D), (T_pad, D) resident
        w_img_ref, w_loc_ref,               # VMEM (F, D), (LOC_PAD, D)   resident
        bias_ref, g_ref, b_ref,             # VMEM (1, D)
        o_ref,                              # VMEM (S_txt + S_img, D)
        wbuf, sem,                          # scratch: VMEM (S_txt, D), DMA sem (1,)
        *, eps, compute_dtype):
    b = pl.program_id(0)
    s_txt, _ = wbuf.shape
    s_img = x_img_ref.shape[0]

    # 1) fire one row-gather DMA per text token (word table stays in HBM).
    def _issue(s, carry):
        idx = txt_ids_smem[b, s]
        pltpu.make_async_copy(word_hbm.at[pl.ds(idx, 1), :],
                              wbuf.at[pl.ds(s, 1), :],
                              sem.at[0]).start()
        return carry
    jax.lax.fori_loop(0, s_txt, _issue, 0)

    # 2) image path while the gather DMAs are in flight:
    #    two Linears (f32 accumulate) + bias, LayerNorm in f32, store image rows.
    cd = compute_dtype
    img = (jnp.dot(x_img_ref[...].astype(cd), w_img_ref[...].astype(cd),
                   preferred_element_type=jnp.float32)
           + jnp.dot(x_loc_ref[...].astype(cd), w_loc_ref[...].astype(cd),
                     preferred_element_type=jnp.float32)
           + bias_ref[...])
    o_ref[pl.ds(s_txt, s_img), :] = _layer_norm(
        img, g_ref[...], b_ref[...], eps).astype(o_ref.dtype)

    # 3) wait for all word-row gathers (each wait accounts one row-sized copy).
    def _wait(s, carry):
        pltpu.make_async_copy(word_hbm.at[pl.ds(0, 1), :],
                              wbuf.at[pl.ds(0, 1), :],
                              sem.at[0]).wait()
        return carry
    jax.lax.fori_loop(0, s_txt, _wait, 0)

    # 4) tiny-table gathers as exact one-hot matmuls (padded rows never selected),
    #    position add (position_ids == arange(S_txt)), LayerNorm, store text rows.
    n_pt = pt_tab_ref.shape[0]
    n_tt = tt_tab_ref.shape[0]
    pt_oh = (pt_ids_ref[...] ==
             jax.lax.broadcasted_iota(jnp.int32, (s_txt, n_pt), 1)).astype(jnp.float32)
    tt_oh = (tt_ids_ref[...] ==
             jax.lax.broadcasted_iota(jnp.int32, (s_txt, n_tt), 1)).astype(jnp.float32)
    txt = (wbuf[...].astype(jnp.float32) + pos_tab_ref[...]
           + jnp.dot(pt_oh, pt_tab_ref[...], preferred_element_type=jnp.float32)
           + jnp.dot(tt_oh, tt_tab_ref[...], preferred_element_type=jnp.float32))
    o_ref[pl.ds(0, s_txt), :] = _layer_norm(
        txt, g_ref[...], b_ref[...], eps).astype(o_ref.dtype)


# ---------------------------------------------------------------------------
# Full module forward (single pallas_call, grid over batch)
# ---------------------------------------------------------------------------
def vdnet_embedding_forward(params, input_txt, pos_tag, input_img, img_loc,
                            token_type_ids, *, eps,
                            compute_dtype=jnp.bfloat16,
                            out_dtype=jnp.float32):
    B, S_txt = input_txt.shape
    _, S_img, F = input_img.shape
    D = params["word_emb"].shape[1]
    S_tot = S_txt + S_img

    # Tiny one-time padding (bytes-to-KB scale) so small contractions are 8-aligned.
    loc_in = img_loc.shape[-1]
    loc_pad = _round_up(loc_in, _SUBLANES)
    x_loc = jnp.pad(img_loc, ((0, 0), (0, 0), (0, loc_pad - loc_in)))
    w_loc = jnp.pad(params["w_loc"], ((0, loc_pad - loc_in), (0, 0)))
    n_pt = _round_up(params["pos_tag_emb"].shape[0], _SUBLANES)
    n_tt = _round_up(params["type_emb"].shape[0], _SUBLANES)
    pt_tab = jnp.pad(params["pos_tag_emb"],
                     ((0, n_pt - params["pos_tag_emb"].shape[0]), (0, 0)))
    tt_tab = jnp.pad(params["type_emb"],
                     ((0, n_tt - params["type_emb"].shape[0]), (0, 0)))
    pos_tab = params["pos_emb"][:S_txt]

    bias = (params["b_img"] + params["b_loc"])[None, :]
    gamma = params["ln_gamma"][None, :]
    beta = params["ln_beta"][None, :]

    txt_ids = input_txt.astype(jnp.int32)                   # -> SMEM (scalar prefetch)
    pt_ids = pos_tag.astype(jnp.int32)[..., None]           # (B, S_txt, 1)
    tt_ids = token_type_ids.astype(jnp.int32)[..., None]    # (B, S_txt, 1)

    word_emb = params["word_emb"]
    word_itm = jnp.dtype(word_emb.dtype).itemsize
    img_itm = jnp.dtype(input_img.dtype).itemsize
    out_itm = jnp.dtype(out_dtype).itemsize

    streaming = (S_img * F * img_itm + S_img * loc_pad * img_itm
                 + 2 * S_txt * 4 + S_tot * D * out_itm
                 + S_txt * D * word_itm)                     # gathered word rows
    resident = 4 * (S_txt * D + n_pt * D + n_tt * D + F * D + loc_pad * D + 3 * D)
    scratch = S_txt * D * word_itm

    grid_spec = pltpu.PrefetchScalarGridSpec(
        num_scalar_prefetch=1,
        grid=(B,),
        in_specs=[
            pl.BlockSpec((None, S_txt, 1), lambda b, ids: (b, 0, 0)),      # pos_tag ids
            pl.BlockSpec((None, S_txt, 1), lambda b, ids: (b, 0, 0)),      # type ids
            pl.BlockSpec((None, S_img, F), lambda b, ids: (b, 0, 0)),      # image feats
            pl.BlockSpec((None, S_img, loc_pad), lambda b, ids: (b, 0, 0)),# image locs
            pl.BlockSpec(memory_space=pl.ANY),                             # word table (HBM)
            pl.BlockSpec((S_txt, D), lambda b, ids: (0, 0)),               # pos table (resident)
            pl.BlockSpec((n_pt, D), lambda b, ids: (0, 0)),                # pos_tag table
            pl.BlockSpec((n_tt, D), lambda b, ids: (0, 0)),                # type table
            pl.BlockSpec((F, D), lambda b, ids: (0, 0)),                   # W_img
            pl.BlockSpec((loc_pad, D), lambda b, ids: (0, 0)),             # W_loc
            pl.BlockSpec((1, D), lambda b, ids: (0, 0)),                   # fused bias
            pl.BlockSpec((1, D), lambda b, ids: (0, 0)),                   # gamma
            pl.BlockSpec((1, D), lambda b, ids: (0, 0)),                   # beta
        ],
        out_specs=pl.BlockSpec((None, S_tot, D), lambda b, ids: (b, 0, 0)),
        scratch_shapes=[pltpu.VMEM((S_txt, D), word_emb.dtype),
                        pltpu.SemaphoreType.DMA((1,))],
    )

    return pl.pallas_call(
        functools.partial(_fused_embedding_kernel, eps=eps,
                          compute_dtype=compute_dtype),
        out_shape=jax.ShapeDtypeStruct((B, S_tot, D), out_dtype),
        grid_spec=grid_spec,
        compiler_params=pltpu.CompilerParams(
            dimension_semantics=("parallel",),   # v7x: split batches across both TCs
            vmem_limit_bytes=_vmem_limit_bytes(streaming, resident + scratch)),
    )(txt_ids, pt_ids, tt_ids, input_img, x_loc, word_emb,
      pos_tab, pt_tab, tt_tab, params["w_img"], w_loc, bias, gamma, beta)


# ---------------------------------------------------------------------------
# Pure-JAX reference for correctness checking
# ---------------------------------------------------------------------------
def reference_forward(params, input_txt, pos_tag, input_img, img_loc,
                      token_type_ids, *, eps):
    B, S_txt = input_txt.shape
    position_ids = jnp.broadcast_to(
        jnp.arange(S_txt, dtype=jnp.int32)[None, :], (B, S_txt))
    txt = (params["word_emb"][input_txt]
           + params["pos_emb"][position_ids]
           + params["pos_tag_emb"][pos_tag]
           + params["type_emb"][token_type_ids])
    img = (input_img @ params["w_img"] + params["b_img"]
           + img_loc @ params["w_loc"] + params["b_loc"])
    x = jnp.concatenate([txt, img], axis=1)
    mean = jnp.mean(x, axis=-1, keepdims=True)
    var = jnp.mean((x - mean) ** 2, axis=-1, keepdims=True)
    return (x - mean) / jnp.sqrt(var + eps) * params["ln_gamma"] + params["ln_beta"]


# ---------------------------------------------------------------------------
if __name__ == "__main__":
    # Small synthetic config
    vocab_size = 100
    max_position_embeddings = 64
    pos_num = 20
    type_vocab_size = 2
    d_model = 32          # == v_hidden_size (required by the concat + LayerNorm)
    v_hidden_size = 32
    v_feature_size = 64
    layer_norm_eps = 1e-12

    B, S_txt, S_img = 2, 8, 4

    key = jax.random.PRNGKey(0)
    keys = jax.random.split(key, 13)

    params = {
        "word_emb":    0.02 * jax.random.normal(keys[0], (vocab_size, d_model), jnp.float32),
        "pos_emb":     0.02 * jax.random.normal(keys[1], (max_position_embeddings, d_model), jnp.float32),
        "pos_tag_emb": 0.02 * jax.random.normal(keys[2], (pos_num, d_model), jnp.float32),
        "type_emb":    0.02 * jax.random.normal(keys[3], (type_vocab_size, d_model), jnp.float32),
        # Linear weights stored (in, out)
        "w_img":       0.02 * jax.random.normal(keys[4], (v_feature_size, v_hidden_size), jnp.float32),
        "b_img":       0.02 * jax.random.normal(keys[5], (v_hidden_size,), jnp.float32),
        "w_loc":       0.02 * jax.random.normal(keys[6], (5, v_hidden_size), jnp.float32),
        "b_loc":       0.02 * jax.random.normal(keys[7], (v_hidden_size,), jnp.float32),
        "ln_gamma":    jnp.ones((d_model,), jnp.float32),
        "ln_beta":     jnp.zeros((d_model,), jnp.float32),
    }

    input_txt = jax.random.randint(keys[8], (B, S_txt), 0, vocab_size, dtype=jnp.int32)
    pos_tag = jax.random.randint(keys[9], (B, S_txt), 0, pos_num, dtype=jnp.int32)
    token_type_ids = jax.random.randint(keys[10], (B, S_txt), 0, type_vocab_size, dtype=jnp.int32)
    input_img = jax.random.normal(keys[11], (B, S_img, v_feature_size), jnp.float32)
    img_loc = jax.random.uniform(keys[12], (B, S_img, 5), jnp.float32)

    fwd_f32 = jax.jit(functools.partial(
        vdnet_embedding_forward, eps=layer_norm_eps,
        compute_dtype=jnp.float32, out_dtype=jnp.float32))
    fwd_bf16c = jax.jit(functools.partial(
        vdnet_embedding_forward, eps=layer_norm_eps,
        compute_dtype=jnp.bfloat16, out_dtype=jnp.float32))
    fwd_bf16o = jax.jit(functools.partial(
        vdnet_embedding_forward, eps=layer_norm_eps,
        compute_dtype=jnp.bfloat16, out_dtype=jnp.bfloat16))

    out_f32 = jax.block_until_ready(
        fwd_f32(params, input_txt, pos_tag, input_img, img_loc, token_type_ids))
    out_bf16c = jax.block_until_ready(
        fwd_bf16c(params, input_txt, pos_tag, input_img, img_loc, token_type_ids))
    out_bf16o = jax.block_until_ready(
        fwd_bf16o(params, input_txt, pos_tag, input_img, img_loc, token_type_ids))

    ref = reference_forward(
        params, input_txt, pos_tag, input_img, img_loc, token_type_ids,
        eps=layer_norm_eps)

    assert out_f32.shape == (B, S_txt + S_img, d_model), out_f32.shape
    assert out_bf16o.dtype == jnp.bfloat16

    # Full-f32 run must match the reference tightly everywhere.
    assert jnp.allclose(out_f32, ref, atol=1e-4, rtol=1e-4), \
        float(jnp.max(jnp.abs(out_f32 - ref)))
    # bf16 image-compute run: text half stays f32-exact, image half loosened for the
    # deterministic bf16 quantization of the image matmul inputs.
    assert jnp.allclose(out_bf16c[:, :S_txt], ref[:, :S_txt], atol=1e-4, rtol=1e-4), \
        float(jnp.max(jnp.abs(out_bf16c[:, :S_txt] - ref[:, :S_txt])))
    assert jnp.allclose(out_bf16c[:, S_txt:], ref[:, S_txt:], atol=3e-2, rtol=3e-2), \
        float(jnp.max(jnp.abs(out_bf16c[:, S_txt:] - ref[:, S_txt:])))
    # bf16-output run (halved writeback): loose tolerance from output quantization.
    out_bf16o_f32 = out_bf16o.astype(jnp.float32)
    assert jnp.allclose(out_bf16o_f32, ref, atol=3e-2, rtol=3e-2), \
        float(jnp.max(jnp.abs(out_bf16o_f32 - ref)))

    print("KERNEL_OK")
</pallas_src>

<mosaic_0001>
module attributes {stable_mosaic.version = 11 : i64} {
  func.func @_fused_embedding_kernel(%arg0: i32, %arg1: memref<2x8xi32, #tpu.memory_space<smem>>, %arg2: memref<1x8x1xi32, #tpu.memory_space<vmem>>, %arg3: memref<1x8x1xi32, #tpu.memory_space<vmem>>, %arg4: memref<1x4x64xf32, #tpu.memory_space<vmem>>, %arg5: memref<1x4x8xf32, #tpu.memory_space<vmem>>, %arg6: memref<100x32xf32, #tpu.memory_space<any>>, %arg7: memref<8x32xf32, #tpu.memory_space<vmem>>, %arg8: memref<24x32xf32, #tpu.memory_space<vmem>>, %arg9: memref<8x32xf32, #tpu.memory_space<vmem>>, %arg10: memref<64x32xf32, #tpu.memory_space<vmem>>, %arg11: memref<8x32xf32, #tpu.memory_space<vmem>>, %arg12: memref<1x32xf32, #tpu.memory_space<vmem>>, %arg13: memref<1x32xf32, #tpu.memory_space<vmem>>, %arg14: memref<1x32xf32, #tpu.memory_space<vmem>>, %arg15: memref<1x12x32xf32, #tpu.memory_space<vmem>>, %arg16: memref<8x32xf32, #tpu.memory_space<vmem>>, %arg17: memref<1x!tpu.dma_semaphore, #tpu.memory_space<semaphore_mem>>) attributes {dimension_semantics = [#tpu.dimension_semantics<parallel>], iteration_bounds = array<i64: 2>, scalar_prefetch = 1 : i64, scratch_operands = 2 : i64, tpu.core_type = #tpu.core_type<tc>, window_params = [{transform_indices = @transform_0, window_bounds = array<i64: 1, 8, 1>}, {transform_indices = @transform_1, window_bounds = array<i64: 1, 8, 1>}, {transform_indices = @transform_2, window_bounds = array<i64: 1, 4, 64>}, {transform_indices = @transform_3, window_bounds = array<i64: 1, 4, 8>}, {}, {pipeline_mode = #tpu.pipeline_mode<synchronous>, transform_indices = @transform_5, window_bounds = array<i64: 8, 32>}, {pipeline_mode = #tpu.pipeline_mode<synchronous>, transform_indices = @transform_6, window_bounds = array<i64: 24, 32>}, {pipeline_mode = #tpu.pipeline_mode<synchronous>, transform_indices = @transform_7, window_bounds = array<i64: 8, 32>}, {pipeline_mode = #tpu.pipeline_mode<synchronous>, transform_indices = @transform_8, window_bounds = array<i64: 64, 32>}, {pipeline_mode = #tpu.pipeline_mode<synchronous>, transform_indices = @transform_9, window_bounds = array<i64: 8, 32>}, {pipeline_mode = #tpu.pipeline_mode<synchronous>, transform_indices = @transform_10, window_bounds = array<i64: 1, 32>}, {pipeline_mode = #tpu.pipeline_mode<synchronous>, transform_indices = @transform_11, window_bounds = array<i64: 1, 32>}, {pipeline_mode = #tpu.pipeline_mode<synchronous>, transform_indices = @transform_12, window_bounds = array<i64: 1, 32>}, {transform_indices = @transform_13, window_bounds = array<i64: 1, 12, 32>}]} {
    %c0_i32 = arith.constant 0 : i32
    %c8_i32 = arith.constant 8 : i32
    %0 = arith.addi %c0_i32, %c8_i32 : i32
    %c1_i32 = arith.constant 1 : i32
    scf.for %arg18 = %c0_i32 to %0 step %c1_i32  : i32 {
      %87 = arith.index_cast %arg0 : i32 to index
      %88 = arith.index_cast %arg18 : i32 to index
      %89 = memref.load %arg1[%87, %88] : memref<2x8xi32, #tpu.memory_space<smem>>
      %c0_i32_55 = arith.constant 0 : i32
      %c0_i32_56 = arith.constant 0 : i32
      %90 = tpu.memref_slice %arg6[%89, %c0_i32_56] : memref<100x32xf32, #tpu.memory_space<any>> -> memref<1x32xf32, #tpu.memory_space<any>>
      %c0_i32_57 = arith.constant 0 : i32
      %91 = tpu.memref_slice %arg16[%arg18, %c0_i32_57] : memref<8x32xf32, #tpu.memory_space<vmem>> -> memref<1x32xf32, #tpu.memory_space<vmem>>
      %92 = tpu.memref_slice %arg17[%c0_i32_55] : memref<1x!tpu.dma_semaphore, #tpu.memory_space<semaphore_mem>> -> memref<1x!tpu.dma_semaphore, #tpu.memory_space<semaphore_mem>>
      %93 = tpu.memref_squeeze %92 : memref<1x!tpu.dma_semaphore, #tpu.memory_space<semaphore_mem>> -> memref<!tpu.dma_semaphore, #tpu.memory_space<semaphore_mem>>
      tpu.enqueue_dma source(%90 : memref<1x32xf32, #tpu.memory_space<any>>) target(%91 : memref<1x32xf32, #tpu.memory_space<vmem>>) target_semaphore(%93 : memref<!tpu.dma_semaphore, #tpu.memory_space<semaphore_mem>>)
    }
    %c8_i32_0 = arith.constant 8 : i32
    %c0 = arith.constant 0 : index
    %c0_1 = arith.constant 0 : index
    %c0_2 = arith.constant 0 : index
    %1 = vector.load %arg4[%c0, %c0_1, %c0_2] : memref<1x4x64xf32, #tpu.memory_space<vmem>>, vector<1x4x64xf32>
    %2 = vector.shape_cast %1 : vector<1x4x64xf32> to vector<4x64xf32>
    %c0_3 = arith.constant 0 : index
    %c0_4 = arith.constant 0 : index
    %3 = vector.load %arg10[%c0_3, %c0_4] : memref<64x32xf32, #tpu.memory_space<vmem>>, vector<64x32xf32>
    %cst = arith.constant dense<0.000000e+00> : vector<4x32xf32>
    %4 = tpu.matmul %2, %3, %cst {dimension_numbers = #tpu.dot_dimension_numbers<[1], [0], [0], [1], [0, 0, 1, 1], [], []>} : vector<4x64xf32>, vector<64x32xf32>, vector<4x32xf32> -> vector<4x32xf32>
    %c0_5 = arith.constant 0 : index
    %c0_6 = arith.constant 0 : index
    %c0_7 = arith.constant 0 : index
    %5 = vector.load %arg5[%c0_5, %c0_6, %c0_7] : memref<1x4x8xf32, #tpu.memory_space<vmem>>, vector<1x4x8xf32>
    %6 = vector.shape_cast %5 : vector<1x4x8xf32> to vector<4x8xf32>
    %c0_8 = arith.constant 0 : index
    %c0_9 = arith.constant 0 : index
    %7 = vector.load %arg11[%c0_8, %c0_9] : memref<8x32xf32, #tpu.memory_space<vmem>>, vector<8x32xf32>
    %cst_10 = arith.constant dense<0.000000e+00> : vector<4x32xf32>
    %8 = tpu.matmul %6, %7, %cst_10 {dimension_numbers = #tpu.dot_dimension_numbers<[1], [0], [0], [1], [0, 0, 1, 1], [], []>} : vector<4x8xf32>, vector<8x32xf32>, vector<4x32xf32> -> vector<4x32xf32>
    %9 = arith.addf %4, %8 : vector<4x32xf32>
    %c0_11 = arith.constant 0 : index
    %c0_12 = arith.constant 0 : index
    %10 = vector.load %arg12[%c0_11, %c0_12] : memref<1x32xf32, #tpu.memory_space<vmem>>, vector<1x32xf32>
    %11 = vector.broadcast %10 : vector<1x32xf32> to vector<4x32xf32>
    %12 = arith.addf %9, %11 : vector<4x32xf32>
    %c0_13 = arith.constant 0 : index
    %c0_14 = arith.constant 0 : index
    %13 = vector.load %arg13[%c0_13, %c0_14] : memref<1x32xf32, #tpu.memory_space<vmem>>, vector<1x32xf32>
    %c0_15 = arith.constant 0 : index
    %c0_16 = arith.constant 0 : index
    %14 = vector.load %arg14[%c0_15, %c0_16] : memref<1x32xf32, #tpu.memory_space<vmem>>, vector<1x32xf32>
    %cst_17 = arith.constant dense<0.000000e+00> : vector<4xf32>
    %15 = vector.multi_reduction <add>, %12, %cst_17 [1] : vector<4x32xf32> to vector<4xf32>
    %16 = vector.shape_cast %15 : vector<4xf32> to vector<4x1xf32>
    %cst_18 = arith.constant 3.200000e+01 : f32
    %17 = vector.broadcast %cst_18 : f32 to vector<4x1xf32>
    %18 = arith.divf %16, %17 : vector<4x1xf32>
    %19 = vector.broadcast %18 : vector<4x1xf32> to vector<4x32xf32>
    %20 = arith.subf %12, %19 : vector<4x32xf32>
    %21 = arith.mulf %20, %20 : vector<4x32xf32>
    %cst_19 = arith.constant dense<0.000000e+00> : vector<4xf32>
    %22 = vector.multi_reduction <add>, %21, %cst_19 [1] : vector<4x32xf32> to vector<4xf32>
    %23 = vector.shape_cast %22 : vector<4xf32> to vector<4x1xf32>
    %cst_20 = arith.constant 3.200000e+01 : f32
    %24 = vector.broadcast %cst_20 : f32 to vector<4x1xf32>
    %25 = arith.divf %23, %24 : vector<4x1xf32>
    %cst_21 = arith.constant 9.99999996E-13 : f32
    %26 = vector.broadcast %cst_21 : f32 to vector<4x1xf32>
    %27 = arith.addf %25, %26 : vector<4x1xf32>
    %28 = math.rsqrt %27 : vector<4x1xf32>
    %29 = vector.broadcast %28 : vector<4x1xf32> to vector<4x32xf32>
    %30 = arith.mulf %20, %29 : vector<4x32xf32>
    %31 = vector.broadcast %13 : vector<1x32xf32> to vector<4x32xf32>
    %32 = arith.mulf %30, %31 : vector<4x32xf32>
    %33 = vector.broadcast %14 : vector<1x32xf32> to vector<4x32xf32>
    %34 = arith.addf %32, %33 : vector<4x32xf32>
    %c0_22 = arith.constant 0 : index
    %c8 = arith.constant 8 : index
    %c0_23 = arith.constant 0 : index
    %35 = vector.load %arg15[%c0_22, %c8, %c0_23] : memref<1x12x32xf32, #tpu.memory_space<vmem>>, vector<1x4x32xf32>
    %36 = vector.shape_cast %35 : vector<1x4x32xf32> to vector<4x32xf32>
    %37 = vector.shape_cast %34 : vector<4x32xf32> to vector<1x4x32xf32>
    tpu.vector_store %arg15[%c0_22, %c8, %c0_23], %37 {strides = array<i32>} : memref<1x12x32xf32, #tpu.memory_space<vmem>>, vector<1x4x32xf32>,
    %c0_i32_24 = arith.constant 0 : i32
    %c8_i32_25 = arith.constant 8 : i32
    %38 = arith.addi %c0_i32_24, %c8_i32_25 : i32
    %c1_i32_26 = arith.constant 1 : i32
    scf.for %arg18 = %c0_i32_24 to %38 step %c1_i32_26  : i32 {
      %c0_i32_55 = arith.constant 0 : i32
      %c0_i32_56 = arith.constant 0 : i32
      %c0_i32_57 = arith.constant 0 : i32
      %87 = tpu.memref_slice %arg6[%c0_i32_56, %c0_i32_57] : memref<100x32xf32, #tpu.memory_space<any>> -> memref<1x32xf32, #tpu.memory_space<any>>
      %c0_i32_58 = arith.constant 0 : i32
      %c0_i32_59 = arith.constant 0 : i32
      %88 = tpu.memref_slice %arg16[%c0_i32_58, %c0_i32_59] : memref<8x32xf32, #tpu.memory_space<vmem>> -> memref<1x32xf32, #tpu.memory_space<vmem>>
      %89 = tpu.memref_slice %arg17[%c0_i32_55] : memref<1x!tpu.dma_semaphore, #tpu.memory_space<semaphore_mem>> -> memref<1x!tpu.dma_semaphore, #tpu.memory_space<semaphore_mem>>
      %90 = tpu.memref_squeeze %89 : memref<1x!tpu.dma_semaphore, #tpu.memory_space<semaphore_mem>> -> memref<!tpu.dma_semaphore, #tpu.memory_space<semaphore_mem>>
      tpu.wait_dma2 semaphore(%90 : memref<!tpu.dma_semaphore, #tpu.memory_space<semaphore_mem>>) src(%87 : memref<1x32xf32, #tpu.memory_space<any>>) dst(%88 : memref<1x32xf32, #tpu.memory_space<vmem>>)
    }
    %c0_27 = arith.constant 0 : index
    %c0_28 = arith.constant 0 : index
    %c0_29 = arith.constant 0 : index
    %39 = vector.load %arg2[%c0_27, %c0_28, %c0_29] : memref<1x8x1xi32, #tpu.memory_space<vmem>>, vector<1x8x1xi32>
    %40 = vector.shape_cast %39 : vector<1x8x1xi32> to vector<8x1xi32>
    %41 = tpu.iota {dimensions = array<i32: 1>} : vector<8x24xi32>
    %42 = vector.broadcast %40 : vector<8x1xi32> to vector<8x24xi32>
    %43 = arith.cmpi eq, %42, %41 : vector<8x24xi32>
    %44 = arith.extui %43 : vector<8x24xi1> to vector<8x24xi32>
    %45 = arith.sitofp %44 : vector<8x24xi32> to vector<8x24xf32>
    %c0_30 = arith.constant 0 : index
    %c0_31 = arith.constant 0 : index
    %c0_32 = arith.constant 0 : index
    %46 = vector.load %arg3[%c0_30, %c0_31, %c0_32] : memref<1x8x1xi32, #tpu.memory_space<vmem>>, vector<1x8x1xi32>
    %47 = vector.shape_cast %46 : vector<1x8x1xi32> to vector<8x1xi32>
    %48 = tpu.iota {dimensions = array<i32: 1>} : vector<8x8xi32>
    %49 = vector.broadcast %47 : vector<8x1xi32> to vector<8x8xi32>
    %50 = arith.cmpi eq, %49, %48 : vector<8x8xi32>
    %51 = arith.extui %50 : vector<8x8xi1> to vector<8x8xi32>
    %52 = arith.sitofp %51 : vector<8x8xi32> to vector<8x8xf32>
    %c0_33 = arith.constant 0 : index
    %c0_34 = arith.constant 0 : index
    %53 = vector.load %arg16[%c0_33, %c0_34] : memref<8x32xf32, #tpu.memory_space<vmem>>, vector<8x32xf32>
    %c0_35 = arith.constant 0 : index
    %c0_36 = arith.constant 0 : index
    %54 = vector.load %arg7[%c0_35, %c0_36] : memref<8x32xf32, #tpu.memory_space<vmem>>, vector<8x32xf32>
    %55 = arith.addf %53, %54 : vector<8x32xf32>
    %c0_37 = arith.constant 0 : index
    %c0_38 = arith.constant 0 : index
    %56 = vector.load %arg8[%c0_37, %c0_38] : memref<24x32xf32, #tpu.memory_space<vmem>>, vector<24x32xf32>
    %cst_39 = arith.constant dense<0.000000e+00> : vector<8x32xf32>
    %57 = tpu.matmul %45, %56, %cst_39 {dimension_numbers = #tpu.dot_dimension_numbers<[1], [0], [0], [1], [0, 0, 1, 1], [], []>} : vector<8x24xf32>, vector<24x32xf32>, vector<8x32xf32> -> vector<8x32xf32>
    %58 = arith.addf %55, %57 : vector<8x32xf32>
    %c0_40 = arith.constant 0 : index
    %c0_41 = arith.constant 0 : index
    %59 = vector.load %arg9[%c0_40, %c0_41] : memref<8x32xf32, #tpu.memory_space<vmem>>, vector<8x32xf32>
    %cst_42 = arith.constant dense<0.000000e+00> : vector<8x32xf32>
    %60 = tpu.matmul %52, %59, %cst_42 {dimension_numbers = #tpu.dot_dimension_numbers<[1], [0], [0], [1], [0, 0, 1, 1], [], []>} : vector<8x8xf32>, vector<8x32xf32>, vector<8x32xf32> -> vector<8x32xf32>
    %61 = arith.addf %58, %60 : vector<8x32xf32>
    %c0_43 = arith.constant 0 : index
    %c0_44 = arith.constant 0 : index
    %62 = vector.load %arg13[%c0_43, %c0_44] : memref<1x32xf32, #tpu.memory_space<vmem>>, vector<1x32xf32>
    %c0_45 = arith.constant 0 : index
    %c0_46 = arith.constant 0 : index
    %63 = vector.load %arg14[%c0_45, %c0_46] : memref<1x32xf32, #tpu.memory_space<vmem>>, vector<1x32xf32>
    %cst_47 = arith.constant dense<0.000000e+00> : vector<8xf32>
    %64 = vector.multi_reduction <add>, %61, %cst_47 [1] : vector<8x32xf32> to vector<8xf32>
    %65 = vector.shape_cast %64 : vector<8xf32> to vector<8x1xf32>
    %cst_48 = arith.constant 3.200000e+01 : f32
    %66 = vector.broadcast %cst_48 : f32 to vector<8x1xf32>
    %67 = arith.divf %65, %66 : vector<8x1xf32>
    %68 = vector.broadcast %67 : vector<8x1xf32> to vector<8x32xf32>
    %69 = arith.subf %61, %68 : vector<8x32xf32>
    %70 = arith.mulf %69, %69 : vector<8x32xf32>
    %cst_49 = arith.constant dense<0.000000e+00> : vector<8xf32>
    %71 = vector.multi_reduction <add>, %70, %cst_49 [1] : vector<8x32xf32> to vector<8xf32>
    %72 = vector.shape_cast %71 : vector<8xf32> to vector<8x1xf32>
    %cst_50 = arith.constant 3.200000e+01 : f32
    %73 = vector.broadcast %cst_50 : f32 to vector<8x1xf32>
    %74 = arith.divf %72, %73 : vector<8x1xf32>
    %cst_51 = arith.constant 9.99999996E-13 : f32
    %75 = vector.broadcast %cst_51 : f32 to vector<8x1xf32>
    %76 = arith.addf %74, %75 : vector<8x1xf32>
    %77 = math.rsqrt %76 : vector<8x1xf32>
    %78 = vector.broadcast %77 : vector<8x1xf32> to vector<8x32xf32>
    %79 = arith.mulf %69, %78 : vector<8x32xf32>
    %80 = vector.broadcast %62 : vector<1x32xf32> to vector<8x32xf32>
    %81 = arith.mulf %79, %80 : vector<8x32xf32>
    %82 = vector.broadcast %63 : vector<1x32xf32> to vector<8x32xf32>
    %83 = arith.addf %81, %82 : vector<8x32xf32>
    %c0_52 = arith.constant 0 : index
    %c0_53 = arith.constant 0 : index
    %c0_54 = arith.constant 0 : index
    %84 = vector.load %arg15[%c0_52, %c0_53, %c0_54] : memref<1x12x32xf32, #tpu.memory_space<vmem>>, vector<1x8x32xf32>
    %85 = vector.shape_cast %84 : vector<1x8x32xf32> to vector<8x32xf32>
    %86 = vector.shape_cast %83 : vector<8x32xf32> to vector<1x8x32xf32>
    tpu.vector_store %arg15[%c0_52, %c0_53, %c0_54], %86 {strides = array<i32>} : memref<1x12x32xf32, #tpu.memory_space<vmem>>, vector<1x8x32xf32>,
    return
  }
  func.func @transform_0(%arg0: i32, %arg1: memref<2x8xi32, #tpu.memory_space<smem>>) -> (i32, i32, i32) {
    %c0_i32 = arith.constant 0 : i32
    %c0_i32_0 = arith.constant 0 : i32
    %c0_i32_1 = arith.constant 0 : i32
    return %arg0, %c0_i32, %c0_i32_0 : i32, i32, i32
  }
  func.func @transform_1(%arg0: i32, %arg1: memref<2x8xi32, #tpu.memory_space<smem>>) -> (i32, i32, i32) {
    %c0_i32 = arith.constant 0 : i32
    %c0_i32_0 = arith.constant 0 : i32
    %c0_i32_1 = arith.constant 0 : i32
    return %arg0, %c0_i32, %c0_i32_0 : i32, i32, i32
  }
  func.func @transform_2(%arg0: i32, %arg1: memref<2x8xi32, #tpu.memory_space<smem>>) -> (i32, i32, i32) {
    %c0_i32 = arith.constant 0 : i32
    %c0_i32_0 = arith.constant 0 : i32
    %c0_i32_1 = arith.constant 0 : i32
    return %arg0, %c0_i32, %c0_i32_0 : i32, i32, i32
  }
  func.func @transform_3(%arg0: i32, %arg1: memref<2x8xi32, #tpu.memory_space<smem>>) -> (i32, i32, i32) {
    %c0_i32 = arith.constant 0 : i32
    %c0_i32_0 = arith.constant 0 : i32
    %c0_i32_1 = arith.constant 0 : i32
    return %arg0, %c0_i32, %c0_i32_0 : i32, i32, i32
  }
  func.func @transform_5(%arg0: i32, %arg1: memref<2x8xi32, #tpu.memory_space<smem>>) -> (i32, i32) {
    %c0_i32 = arith.constant 0 : i32
    %c0_i32_0 = arith.constant 0 : i32
    %c0_i32_1 = arith.constant 0 : i32
    return %c0_i32, %c0_i32_0 : i32, i32
  }
  func.func @transform_6(%arg0: i32, %arg1: memref<2x8xi32, #tpu.memory_space<smem>>) -> (i32, i32) {
    %c0_i32 = arith.constant 0 : i32
    %c0_i32_0 = arith.constant 0 : i32
    %c0_i32_1 = arith.constant 0 : i32
    return %c0_i32, %c0_i32_0 : i32, i32
  }
  func.func @transform_7(%arg0: i32, %arg1: memref<2x8xi32, #tpu.memory_space<smem>>) -> (i32, i32) {
    %c0_i32 = arith.constant 0 : i32
    %c0_i32_0 = arith.constant 0 : i32
    %c0_i32_1 = arith.constant 0 : i32
    return %c0_i32, %c0_i32_0 : i32, i32
  }
  func.func @transform_8(%arg0: i32, %arg1: memref<2x8xi32, #tpu.memory_space<smem>>) -> (i32, i32) {
    %c0_i32 = arith.constant 0 : i32
    %c0_i32_0 = arith.constant 0 : i32
    %c0_i32_1 = arith.constant 0 : i32
    return %c0_i32, %c0_i32_0 : i32, i32
  }
  func.func @transform_9(%arg0: i32, %arg1: memref<2x8xi32, #tpu.memory_space<smem>>) -> (i32, i32) {
    %c0_i32 = arith.constant 0 : i32
    %c0_i32_0 = arith.constant 0 : i32
    %c0_i32_1 = arith.constant 0 : i32
    return %c0_i32, %c0_i32_0 : i32, i32
  }
  func.func @transform_10(%arg0: i32, %arg1: memref<2x8xi32, #tpu.memory_space<smem>>) -> (i32, i32) {
    %c0_i32 = arith.constant 0 : i32
    %c0_i32_0 = arith.constant 0 : i32
    %c0_i32_1 = arith.constant 0 : i32
    return %c0_i32, %c0_i32_0 : i32, i32
  }
  func.func @transform_11(%arg0: i32, %arg1: memref<2x8xi32, #tpu.memory_space<smem>>) -> (i32, i32) {
    %c0_i32 = arith.constant 0 : i32
    %c0_i32_0 = arith.constant 0 : i32
    %c0_i32_1 = arith.constant 0 : i32
    return %c0_i32, %c0_i32_0 : i32, i32
  }
  func.func @transform_12(%arg0: i32, %arg1: memref<2x8xi32, #tpu.memory_space<smem>>) -> (i32, i32) {
    %c0_i32 = arith.constant 0 : i32
    %c0_i32_0 = arith.constant 0 : i32
    %c0_i32_1 = arith.constant 0 : i32
    return %c0_i32, %c0_i32_0 : i32, i32
  }
  func.func @transform_13(%arg0: i32, %arg1: memref<2x8xi32, #tpu.memory_space<smem>>) -> (i32, i32, i32) {
    %c0_i32 = arith.constant 0 : i32
    %c0_i32_0 = arith.constant 0 : i32
    %c0_i32_1 = arith.constant 0 : i32
    return %arg0, %c0_i32, %c0_i32_0 : i32, i32, i32
  }
}

</mosaic_0001>

<bundles_post_ra>
// kernel: vdnet_embedding_forward.1
= control target key start
LH: loop header
LB: loop body
LE: loop exit
PB: predicated region body
PF: predicated region fallthrough
CT: control target
= control target key end

     0   :  { %s1450_s0 = inlined_call_operand.vmem [shape: s32[2,8], index: 0, kind: input, shape index: {}]   ;;  %s1451_s1 = inlined_call_operand.vmem [shape: s32[2,8,1], index: 1, kind: input, shape index: {}]   ;;  %s1452_s2 = inlined_call_operand.vmem [shape: s32[2,8,1], index: 2, kind: input, shape index: {}]   ;;  %s1453_s3 = inlined_call_operand.vmem [shape: f32[2,4,64], index: 3, kind: input, shape index: {}]   ;;  %s1454_s4 = inlined_call_operand.vmem [shape: f32[2,4,8], index: 4, kind: input, shape index: {}]   ;;  %s1455_s5 = inlined_call_operand.vmem [shape: f32[100,32], index: 5, kind: input, shape index: {}]   ;;  %s1456_s6 = inlined_call_operand.vmem [shape: f32[8,32], index: 6, kind: input, shape index: {}]   ;;  %s1457_s7 = inlined_call_operand.vmem [shape: f32[24,32], index: 7, kind: input, shape index: {}]   ;;  %s1458_s8 = inlined_call_operand.vmem [shape: f32[8,32], index: 8, kind: input, shape index: {}]   ;;  %s1459_s9 = inlined_call_operand.vmem [shape: f32[64,32], index: 9, kind: input, shape index: {}]   ;;  %s1460_s10 = inlined_call_operand.vmem [shape: f32[8,32], index: 10, kind: input, shape index: {}]   ;;  %s1461_s11 = inlined_call_operand.vmem [shape: f32[1,32], index: 11, kind: input, shape index: {}]   ;;  %s1462_s12 = inlined_call_operand.vmem [shape: f32[1,32], index: 12, kind: input, shape index: {}]   ;;  %s1463_s13 = inlined_call_operand.vmem [shape: f32[1,32], index: 13, kind: input, shape index: {}]   ;;  %s1464_s14 = inlined_call_operand.vmem [shape: f32[2,12,32], index: 14, kind: output, shape index: {}]  }
   0x1   :  { %1466 = sst [smem:[#allocation10_spill]] %s1451_s1  ;;  %s19_s15 = sshll.u32 %s1450_s0, 4  ;;  %s20_s15 = int_to_ptr.vmem [resolvable:$true] %s19_s15 }
   0x2   :  { %1467 = sst [smem:[#allocation11_spill]] %s1452_s2  ;;  %s1194_s16 = scalar_lea.vmem %s20_s15, 32 }
   0x3   :  { %1468 = sst [smem:[#allocation12_spill]] %s1456_s6  ;;  %p1195_p0 = scmp.ne.s32.totalorder %s20_s15, %s1194_s16 }
   0x4   :  { %p1199_p1 = scmp.lt.s32.totalorder %s20_s15, %s20_s15  ;;  %p1200_p2 = scmp.lt.s32.totalorder %s1194_s16, %s1194_s16 }
   0x6   :  { %p1201_p3 = por %p1200_p2, %p1199_p1 }
   0x8   :  { %p1202_p4 = pnand %p1201_p3, %p1195_p0 }
   0xa   :  { %1205 = shalt.err (!%p1202_p4)  }
   0xb   :  { %s1234_s17 = smov [#allocation5]  }
   0xc   :  { %22 = dma.vmem_to_smem %s20_s15, 32, %s1234_s17, [#allocation4] }
   0xd   :  { %1218 = dma.done.wait [#allocation4], 32 }
   0xe   :  { %1219 = vsyncadd [#allocation4], 4294967264 }
   0xf   :  { %24 = sfence }
  0x10   :  { %s1317_s18 = smov 0  }
  0x11 LB: > { %1469 = sst [smem:[#allocation9_spill]] %s1224_s18  ;;  %s1323_s0 = sadd.s32 4294967295, %s1224_s18   ;;  %s1224_s18 = sphi %s1317_s18, %s30_s18  }
  0x12   : > { %p1064_p5 = scmp.ge.s32.totalorder %s1224_s18, 1  ;;  %p396_p6 = scmp.lt.s32.totalorder %s1224_s18, 3 }
  0x14   : > { %p397_p7 = pnand %p1064_p5, %p396_p6 }
  0x15   : > { %p449_p8 = scmp.lt.s32.totalorder (!%p397_p7), %s1323_s0, 1  ;;  %s1470_s1 = sld [smem:[#allocation10_spill]] (!%p397_p7) }
  0x16   : > { %400 = sbr.rel (%p397_p7) target bundleno = 1270 (0x4f6), region = 68  ;;  %s1471_s2 = sld [smem:[#allocation11_spill]] (!%p397_p7) }
  0x1d   : > { %s450_s19 = scalar_select %p449_p8, %s1323_s0, 1 }
  0x1f   : > { %s1065_s20 = sshll.u32 %s450_s19, 3  ;;  %s1067_s21 = sshll.u32 %s450_s19, 2 }
  0x20   : > { %s1332_s24 = scalar_lea.vmem %s1470_s1, %s1065_s20  ;;  %s1337_s27 = scalar_lea.vmem %s1471_s2, %s1065_s20 }
  0x21   : > { %s1342_s30 = scalar_lea.vmem %s1453_s3, %s1067_s21  ;;  %s1347_s17 = scalar_lea.vmem %s1454_s4, %s1067_s21 }
  0x22   : > { %s1086_s18 = sshll.u32 %s450_s19, 4  ;;  %s1226_s1 = smov 0  }
  0x23   : > { %s1352_s23 = scalar_lea.vmem %s1464_s14, %s1086_s18 }
  0x24 LB: >> { %s476_s20 = sshra.s32 %s1228_s1, 7  ;;  %s481_s25 = sand.u32 127, %s1228_s1  ;;  %s1228_s1 = sphi %s1226_s1, %s475_s1  }
  0x25   : >> { %s478_s26 = sadd.s32 %s1323_s0, %s476_s20  ;;  %s485_s16 = scalar_lea.vmem [#allocation2], %s1228_s1 }
  0x26   : >> { %s1071_s28 = sshll.u32 %s478_s26, 7 }
  0x27   : >> { %s482_s29 = sadd.s32 %s1071_s28, %s481_s25 }
  0x28   : >> { %s483_s2 = sld [smem:[#allocation5 + %s482_s29]] }
  0x2e   : >> { %s484_s19 = scalar_lea.vmem %s1455_s5, %s483_s2 }
  0x2f   : >> { %v503_v0 = vld [vmem:[%s484_s19] sm:$0x1] }
  0x30   : >> { %504 = vst [vmem:[%s485_s16] sm:$0x1] %v503_v0 }
  0x31   : >> { %529 = vsyncadd [#allocation3], 16  ;;  %s475_s1 = sadd.s32 1, %s1228_s1  }
  0x32   : >> { %p472_p9 = scmp.ge.s32.totalorder %s475_s1, 8  }
  0x33   : > { %v531_v1 = vld [vmem:[%s1459_s9] sm:$0xff] (%p472_p9)  ;;  %v532_v2 = vld [vmem:[%s1459_s9 + $0x8] sm:$0xff] (%p472_p9)  ;;  %v533_v3 = vld [vmem:[%s1459_s9 + $0x10] sm:$0xff] (%p472_p9)  ;;  %v1235_v4 = vmov (%p472_p9), 0.0|0.0   ;;  %v1236_v7 = vmov (%p472_p9), 0.0   ;;  %vm541_vm0 = vcmask (%p472_p9), 64512  }
  0x34   : > { %474 = sbr.rel (!%p472_p9) target bundleno = 36 (0x24), region = 163  ;;  %1142 = vmatprep.subr.bf16.mxu1 (%p472_p9), %v1235_v4  ;;  %v1143_v5 = vpack.c.bf16 (%p472_p9), %v532_v2, %v531_v1  ;;  %v534_v6 = vld [vmem:[%s1459_s9 + $0x18] sm:$0xff] (%p472_p9)  ;;  %1104 = vmatprep.subr.mxu0 (%p472_p9), %v1236_v7  ;;  %v540_v8 = vld [vmem:[%s1460_s10] sm:$0xff] (%p472_p9)  ;;  %vm1237_vm1 = vmmov (%p472_p9), 0   ;;  %v536_v12 = vld [vmem:[%s1459_s9 + $0x28] sm:$0xff] (%p472_p9)  ;;  %vm615_vm2 = vcmask (%p472_p9), 523264  }
  0x35   : > { %1106 = vmatprep.mubr.msk.f32.mxu0 (%p472_p9), %vm1237_vm1, %v1236_v7  ;;  %1125 = vmatprep.mubr.msk.f32.mxu1 (%p472_p9), %vm1237_vm1, %v1236_v7  ;;  %v1146_v9 = vpack.c.bf16 (%p472_p9), %v534_v6, %v533_v3  ;;  %v539_v10 = vld [vmem:[%s1347_s17] sm:$0xf] (%p472_p9)  ;;  %v537_v14 = vld [vmem:[%s1459_s9 + $0x30] sm:$0xff] (%p472_p9)  ;;  %v538_v15 = vld [vmem:[%s1459_s9 + $0x38] sm:$0xff] (%p472_p9)  ;;  %vm699_vm3 = vcmask (%p472_p9), 257024   ;;  %s1230_s1 = smov (%p472_p9), 0  }
  0x36   : > { %1144 = vmatpush3.bf16.msra.mxu1 (%p472_p9), %v1143_v5  ;;  %1105 = vmatpush3.msra.mxu0 (%p472_p9), %v540_v8  ;;  %v535_v11 = vld [vmem:[%s1459_s9 + $0x20] sm:$0xff] (%p472_p9)  ;;  %v1152_v16 = vpack.c.bf16 (%p472_p9), %v538_v15, %v537_v14 }
  0x37   : > { %1145 = vmatprep.subr.bf16.mxu1 (%p472_p9), %v1235_v4  ;;  %1107 = vmatmul.mubr.msk.f32.vlgmr.msra.gmra.mrb[0].mxu0 (%p472_p9), %vm541_vm0, %v539_v10  ;;  %v1149_v13 = vpack.c.bf16 (%p472_p9), %v536_v12, %v535_v11  ;;  %v530_v17 = vld [vmem:[%s1342_s30] sm:$0xf] (%p472_p9) }
  0x38   : > { %v1074_v21 = vld [vmem:[%s1461_s11] ss:$0 sm:$0xff] (%p472_p9) }
  0x39   : > { %v1075_v35 = vld [vmem:[%s1462_s12] ss:$0 sm:$0xff] (%p472_p9) }
  0x3a   : > { %1147 = vmatpush3.bf16.msra.mxu1 (%p472_p9), %v1146_v9  ;;  %v1076_v37 = vld [vmem:[%s1463_s13] ss:$0 sm:$0xff] (%p472_p9) }
  0x3b   : > { %1148 = vmatprep.subr.bf16.mxu1 %v1235_v4 }
  0x3e   : > { %1150 = vmatpush3.bf16.msra.mxu1 %v1149_v13 }
  0x3f   : > { %1151 = vmatprep.subr.bf16.mxu1 %v1235_v4 }
  0x42   : > { %1153 = vmatpush3.bf16.msra.mxu1 %v1152_v16 }
  0x45   : > { %1126 = vmatmul.mubr.msk.f32.vlgmr.msra.gmra.mrb[0].mxu1 %vm615_vm2, %v530_v17 }
 0x10a   : > { %v611_v18 = vpop.f32.mrb[0].mxu0 }
 0x10b   : > { %v1108_v19 = vpop.f32.mrb[1].mxu0 }
 0x118   : > { %v685_v20 = vpop.f32.mrb[0].mxu1 }
 0x119   : > { %v686_v22 = vadd.f32 %v685_v20, %v611_v18  ;;  %v1127_v23 = vpop.f32.mrb[1].mxu1 }
 0x11b   : > { %v696_v24 = vadd.f32 %v1074_v21, %v686_v22 }
 0x11d   : > { %v700_v25 = vsel %vm699_vm3, %v696_v24, 0.0 }
 0x11e   : > { %701 = vadd.xlane.f32.xlu0 %v700_v25 }
 0x1ab   : > { %v702_v26 = vpop.xlane.xlu0 %701 }
 0x1ac   : > { %v704_v27 = vmul.f32 0.03125, %v702_v26 }
 0x1ae   : > { %v705_v28 = vsub.f32 %v696_v24, %v704_v27 }
 0x1b0   : > { %v706_v29 = vmul.f32 %v705_v28, %v705_v28 }
 0x1b2   : > { %v707_v30 = vsel %vm699_vm3, %v706_v29, 0.0 }
 0x1b3   : > { %708 = vadd.xlane.f32.xlu0 %v707_v30 }
 0x240   : > { %v709_v31 = vpop.xlane.xlu0 %708 }
 0x241   : > { %v710_v32 = vmul.f32 0.03125, %v709_v31 }
 0x243   : > { %v711_v33 = vadd.f32 1e-12, %v710_v32 }
 0x245   : > { %1189 = vrsqrt.f32 %v711_v33 }
 0x24f   : > { %v1190_v34 = vpop.eup %1189 }
 0x250   : > { %v713_v36 = vmul.f32 %v1190_v34, %v705_v28 }
 0x252   : > { %v720_v38 = vmul.f32 %v1075_v35, %v713_v36 }
 0x254   : > { %v727_v39 = vadd.f32 %v1076_v37, %v720_v38 }
 0x256   : > { %728 = vst.msk [vmem:[%s1352_s23 + $0x8] sm:$0xf] %vm699_vm3, %v727_v39 }
 0x257 LB: >> { %1220 = dma.done.wait [#allocation3], 16  ;;  %s1232_s1 = sphi %s1230_s1, %s734_s1  }
 0x258   : >> { %1221 = vsyncadd [#allocation3], 4294967280  ;;  %s734_s1 = sadd.s32 1, %s1232_s1  }
 0x259   : >> { %p731_p10 = scmp.ge.s32.totalorder %s734_s1, 8  }
 0x25a   : > { %v738_v40 = vld [vmem:[%s1332_s24] sm:$0xff] (%p731_p10)  ;;  %1154 = vmatprep.subr.bf16.mxu0 (%p731_p10), %v1235_v4  ;;  %1134 = vmatprep.mubr.msk.f32.mxu0 (%p731_p10), %vm1237_vm1, %v1236_v7  ;;  %v1238_v42 = vmov (%p731_p10), 0   ;;  %v758_v43 = vld [vmem:[%s1457_s7 + $0x8] sm:$0xff] (%p731_p10)  ;;  %v759_v46 = vld [vmem:[%s1457_s7 + $0x10] sm:$0xff] (%p731_p10)  ;;  %v739_v47 = vlaneseq (%p731_p10)  ;;  %vm760_vm4 = vcmask (%p731_p10), 195584   ;;  %s1472_s17 = sld [smem:[#allocation12_spill]] (%p731_p10) }
 0x25b   : > { %733 = sbr.rel (!%p731_p10) target bundleno = 599 (0x257), region = 174  ;;  %v757_v41 = vld [vmem:[%s1457_s7] sm:$0xff] (%p731_p10)  ;;  %1191 = vset.pattern.permute.xlu0 (%p731_p10), %v1238_v42  ;;  %vm912_vm7 = vcmask (%p731_p10), 261120  }
 0x25c   : > { %742 = vperm.xlu0 (%p731_p10), %1191, %v738_v40   ;;  %v1155_v44 = vpack.c.bf16 (%p731_p10), %v758_v43, %v757_v41  ;;  %v747_v45 = vld [vmem:[%s1337_s27] sm:$0xff] (%p731_p10)  ;;  %v740_v48 = vand.u32 (%p731_p10), 127, %v739_v47 }
 0x25d   : > { %v835_v50 = vld [vmem:[%s1458_s8] sm:$0xff] (%p731_p10) }
 0x25e   : > { %1156 = vmatpush3.bf16.msra.mxu0 (%p731_p10), %v1155_v44  ;;  %v754_v54 = vld [vmem:[#allocation2] sm:$0xff] (%p731_p10) }
 0x25f   : > { %1132 = vmatprep.subr.mxu0 (%p731_p10), %v1236_v7  ;;  %v1081_v6 = vld [vmem:[%s1462_s12] ss:$0 sm:$0xff] (%p731_p10) }
 0x260   : > { %749 = vperm.xlu0 (%p731_p10), %1191, %v747_v45   ;;  %v755_v55 = vld [vmem:[%s1472_s17] sm:$0xff] (%p731_p10) }
 0x261   : > { %v756_v56 = vadd.f32 (%p731_p10), %v755_v55, %v754_v54  ;;  %v1082_v8 = vld [vmem:[%s1463_s13] ss:$0 sm:$0xff] (%p731_p10) }
 0x262   : > { %1133 = vmatpush3.msra.mxu0 %v759_v46 }
 0x263   : > { %1137 = vmatprep.subr.mxu0 %v1236_v7 }
 0x2db   : > { %v743_v49 = vpop.permute.xlu0 %742 }
 0x2dc   : > { %vm744_vm5 = vcmp.eq.s32.totalorder %v743_v49, %v740_v48 }
 0x2dd   : > { %v1077_v51 = vsel %vm744_vm5, 1.0, %v1236_v7 }
 0x2de   : > { %1135 = vmatmul.mubr.msk.f32.vlgmr.msra.gmra.mrb[2].mxu0 %vm760_vm4, %v1077_v51 }
 0x2df   : > { %1138 = vmatpush3.msra.mxu0 %v835_v50  ;;  %v750_v52 = vpop.permute.xlu0 %749  ;;  %1139 = vmatprep.mubr.msk.f32.mxu0 %vm1237_vm1, %v1236_v7 }
 0x2e0   : > { %vm751_vm6 = vcmp.eq.s32.totalorder %v750_v52, %v740_v48 }
 0x2e1   : > { %v1078_v53 = vsel %vm751_vm6, 1.0, %v1236_v7 }
 0x2e6   : > { %1140 = vmatmul.mubr.msk.f32.vlgmr.msra.gmra.mrb[2].mxu0 %vm541_vm0, %v1078_v53 }
 0x3b9   : > { %v905_v57 = vpop.f32.mrb[2].mxu0 }
 0x3ba   : > { %v1157_v58 = vadd.f32 %v905_v57, %v756_v56  ;;  %v1141_v59 = vpop.f32.mrb[3].mxu0 }
 0x3bc   : > { %v913_v60 = vsel %vm912_vm7, %v1157_v58, 0.0 }
 0x3bd   : > { %914 = vadd.xlane.f32.xlu1 %v913_v60 }
 0x44a   : > { %v915_v61 = vpop.xlane.xlu1 %914 }
 0x44b   : > { %v916_v62 = vmul.f32 0.03125, %v915_v61 }
 0x44d   : > { %v917_v63 = vsub.f32 %v1157_v58, %v916_v62 }
 0x44f   : > { %v918_v0 = vmul.f32 %v917_v63, %v917_v63 }
 0x451   : > { %v919_v1 = vsel %vm912_vm7, %v918_v0, 0.0 }
 0x452   : > { %920 = vadd.xlane.f32.xlu1 %v919_v1 }
 0x4df   : > { %v921_v2 = vpop.xlane.xlu1 %920 }
 0x4e0   : > { %v922_v3 = vmul.f32 0.03125, %v921_v2 }
 0x4e2   : > { %v923_v4 = vadd.f32 1e-12, %v922_v3 }
 0x4e4   : > { %1192 = vrsqrt.f32 %v923_v4 }
 0x4ee   : > { %v1193_v5 = vpop.eup %1192 }
 0x4ef   : > { %v925_v7 = vmul.f32 %v1193_v5, %v917_v63 }
 0x4f1   : > { %v932_v9 = vmul.f32 %v1081_v6, %v925_v7 }
 0x4f3   : > { %v939_v10 = vadd.f32 %v1082_v8, %v932_v9 }
 0x4f5   : > { %940 = vst.msk [vmem:[%s1352_s23] sm:$0xff] %vm912_vm7, %v939_v10 }
 0x4f6 PF: > { %s1473_s25 = sld [smem:[#allocation9_spill]] }
 0x4fc   : > { %s30_s18 = sadd.s32 1, %s1473_s25  }
 0x4fd   : > { %p27_p11 = scmp.ge.s32.totalorder %s30_s18, 4  }
 0x4ff   :  { %29 = sbr.rel (!%p27_p11) target bundleno = 17 (0x11), region = 185 }
 0x506   :  { %962 = vsyncmov [#allocation3] }
 0x509   :  { %s963_s26 = vpop.sfrf %962 }
 0x50a   :  { %p1085_p12 = scmp.ne.s32.totalorder %s963_s26, 0 }
 0x50c   :  { %967 = shalt.err (%p1085_p12)  }

</bundles_post_ra>
